<compile_context>
chip_gen: v7x
topology: tpu7x:2x2x1
jax: 0.10.0
libtpu: 0.0.40
codegen_flags: <defaults>
</compile_context>

<pallas_src>
import functools

import jax
import jax.numpy as jnp
from jax import lax
from jax.experimental import pallas as pl
from jax.experimental.pallas import tpu as pltpu

_EPS_NORM = 1e-5
_EPS_PN = 1e-8


@functools.lru_cache(maxsize=None)
def _vmem_budget():
    """Returns (vmem_limit_bytes, per-input row-tile byte budget) for this chip."""
    try:
        cap = int(pltpu.get_tpu_info().vmem_capacity_bytes)
    except Exception:  # off-device tracing / unknown chip: safe everywhere
        cap = 64 * 1024 * 1024
    # ~30% headroom for compiler scratch; never ask for more than 96 MiB.
    limit = min(int(cap * 0.7), 96 * 1024 * 1024)
    # Tile budget: (in + out) x double buffering + in-kernel temporaries stay
    # well inside `limit` on every generation (v5e/v6e ~8 MiB tiles, v7x ~4.5).
    tile_budget = max(1 * 1024 * 1024, min(limit // 10, 8 * 1024 * 1024))
    return limit, tile_budget


def _sublane(dtype):
    # 8 rows for f32, 16 for bf16, 32 for int8/fp8 (sublane packing).
    return max(8, 32 // jnp.dtype(dtype).itemsize)


def _pick_row_tile(M, C, dtype, budget_bytes):
    """Row tile for a flattened (M, C) array, sized by bytes (no fixed row cap)."""
    itemsize = jnp.dtype(dtype).itemsize
    sub = _sublane(dtype)
    rows = max(sub, budget_bytes // max(1, C * itemsize))
    rows = max(sub, (rows // sub) * sub)  # dtype-aware sublane alignment
    return M if M <= rows else rows


# ---------------- kernels ----------------

def _ln_kernel(x_ref, w_ref, b_ref, o_ref):
    # x_ref: (TILE, C) rows; LayerNorm over C.  Single-pass sum/sumsq.
    x = x_ref[...].astype(jnp.float32)
    c = x.shape[-1]
    s = jnp.sum(x, axis=-1, keepdims=True)
    sq = jnp.sum(x * x, axis=-1, keepdims=True)
    mean = s * (1.0 / c)
    var = jnp.maximum(sq * (1.0 / c) - mean * mean, 0.0)  # clamp: cancellation safety
    rstd = lax.rsqrt(var + _EPS_NORM)
    o_ref[...] = ((x - mean) * rstd * w_ref[...] + b_ref[...]).astype(o_ref.dtype)


def _pn_kernel(x_ref, o_ref):
    # x_ref: (TILE, C) rows; PixelNorm over C.
    x = x_ref[...].astype(jnp.float32)
    ms = jnp.mean(x * x, axis=-1, keepdims=True)
    o_ref[...] = (x * lax.rsqrt(ms + _EPS_PN)).astype(o_ref.dtype)


def _bn_stats_kernel(x_ref, sum_ref, sq_ref, *,
                     total_rows, tile_rows, tiles_per_split, needs_mask):
    # BatchNorm pass 1: per-channel sum / sum-of-squares over row tiles of the
    # flattened (B*N, C) array.  Grid = (split 'parallel', tile 'arbitrary'):
    # the leading split axis lets v7x's two TensorCores stream HBM in parallel;
    # each split owns its own (1, 1, C) resident partial accumulators.
    s = pl.program_id(0)
    i = pl.program_id(1)

    @pl.when(i == 0)
    def _():
        sum_ref[...] = jnp.zeros_like(sum_ref)
        sq_ref[...] = jnp.zeros_like(sq_ref)

    x = x_ref[...].astype(jnp.float32)            # (TILE, C)
    if needs_mask:
        # Cheap boundary mask: (TILE, 1) iota broadcast over lanes.  Also zeroes
        # the clamped duplicate tiles an uneven split maps past the array end.
        row0 = (s * tiles_per_split + i) * tile_rows
        ids = lax.broadcasted_iota(jnp.int32, (tile_rows, 1), 0)
        x = jnp.where(ids + row0 < total_rows, x, 0.0)

    sum_ref[...] += jnp.sum(x, axis=0, keepdims=True)[None]
    sq_ref[...] += jnp.sum(x * x, axis=0, keepdims=True)[None]


def _affine_kernel(x_ref, scale_ref, shift_ref, o_ref):
    # BatchNorm pass 2: elementwise x * scale + shift on a (TILE, C) row tile.
    x = x_ref[...].astype(jnp.float32)
    o_ref[...] = (x * scale_ref[...] + shift_ref[...]).astype(o_ref.dtype)


def _in_fused_kernel(x_ref, o_ref):
    # InstanceNorm (short-sequence path): whole (1, N, C) slice in one shot.
    x = x_ref[...].astype(jnp.float32)
    n = x.shape[1]
    s = jnp.sum(x, axis=1, keepdims=True)
    sq = jnp.sum(x * x, axis=1, keepdims=True)
    mean = s * (1.0 / n)
    var = jnp.maximum(sq * (1.0 / n) - mean * mean, 0.0)
    o_ref[...] = ((x - mean) * lax.rsqrt(var + _EPS_NORM)).astype(o_ref.dtype)


def _in_stats_kernel(x_ref, mean_ref, rstd_ref, *, total_n, tile_n, needs_mask):
    # InstanceNorm pass 1 (long-sequence path): per-(b, c) sum / sumsq over N
    # tiles; accumulators are the (1, 1, C) outputs resident across the N axis,
    # finalized in place to (mean, rstd) on the last tile of each batch.
    i = pl.program_id(1)

    @pl.when(i == 0)
    def _():
        mean_ref[...] = jnp.zeros_like(mean_ref)
        rstd_ref[...] = jnp.zeros_like(rstd_ref)

    x = x_ref[...].astype(jnp.float32)            # (1, TILE_N, C)
    if needs_mask:
        ids = lax.broadcasted_iota(jnp.int32, (1, tile_n, 1), 1) + i * tile_n
        x = jnp.where(ids < total_n, x, 0.0)

    mean_ref[...] += jnp.sum(x, axis=1, keepdims=True)
    rstd_ref[...] += jnp.sum(x * x, axis=1, keepdims=True)

    @pl.when(i == pl.num_programs(1) - 1)
    def _():
        m = mean_ref[...] * (1.0 / total_n)
        var = jnp.maximum(rstd_ref[...] * (1.0 / total_n) - m * m, 0.0)
        mean_ref[...] = m
        rstd_ref[...] = lax.rsqrt(var + _EPS_NORM)


def _in_norm_kernel(x_ref, mean_ref, rstd_ref, o_ref):
    # InstanceNorm pass 2: elementwise normalize a (1, TILE_N, C) tile.
    x = x_ref[...].astype(jnp.float32)
    o_ref[...] = ((x - mean_ref[...]) * rstd_ref[...]).astype(o_ref.dtype)


# ---------------- wrappers ----------------

def _rowwise_call(kernel, x2, extra_args, tile, vmem_limit):
    """Run a per-row kernel over a flattened (M, C) array with row tiling."""
    M, C = x2.shape
    grid = (pl.cdiv(M, tile),)
    in_specs = [pl.BlockSpec((tile, C), lambda i: (i, 0))]
    in_specs += [pl.BlockSpec((1, C), lambda i: (0, 0)) for _ in extra_args]
    return pl.pallas_call(
        kernel,
        out_shape=jax.ShapeDtypeStruct((M, C), x2.dtype),
        grid=grid,
        in_specs=in_specs,
        out_specs=pl.BlockSpec((tile, C), lambda i: (i, 0)),
        compiler_params=pltpu.CompilerParams(
            dimension_semantics=("parallel",),
            vmem_limit_bytes=vmem_limit),
    )(x2, *extra_args)


def custom_norm(x, norm_type, params, tile_budget_bytes=None):
    """x: (B, N, C).  params: dict with 'weight'/'bias' of shape (C,) for affine norms."""
    B, N, C = x.shape

    if norm_type == "none":
        return x

    vmem_limit, auto_budget = _vmem_budget()
    budget = auto_budget if tile_budget_bytes is None else tile_budget_bytes

    if norm_type in ("ln", "pn"):
        M = B * N
        x2 = x.reshape(M, C)
        tile = _pick_row_tile(M, C, x.dtype, budget)
        if norm_type == "ln":
            w2 = params["weight"].reshape(1, C).astype(jnp.float32)
            b2 = params["bias"].reshape(1, C).astype(jnp.float32)
            y2 = _rowwise_call(_ln_kernel, x2, (w2, b2), tile, vmem_limit)
        else:
            y2 = _rowwise_call(_pn_kernel, x2, (), tile, vmem_limit)
        return y2.reshape(B, N, C)

    if norm_type == "in":
        tile_n = _pick_row_tile(N, C, x.dtype, budget)

        if tile_n == N:
            # Whole (N, C) slice fits the per-chip tile budget: one fused pass.
            return pl.pallas_call(
                _in_fused_kernel,
                out_shape=jax.ShapeDtypeStruct((B, N, C), x.dtype),
                grid=(B,),
                in_specs=[pl.BlockSpec((1, N, C), lambda b: (b, 0, 0))],
                out_specs=pl.BlockSpec((1, N, C), lambda b: (b, 0, 0)),
                compiler_params=pltpu.CompilerParams(
                    dimension_semantics=("parallel",),
                    vmem_limit_bytes=vmem_limit),
            )(x)

        # Long-sequence path: two tiled passes over N (bounded VMEM on v7x).
        nt = pl.cdiv(N, tile_n)
        needs_mask = nt * tile_n > N

        mean, rstd = pl.pallas_call(
            functools.partial(_in_stats_kernel, total_n=N, tile_n=tile_n,
                              needs_mask=needs_mask),
            out_shape=(jax.ShapeDtypeStruct((B, 1, C), jnp.float32),
                       jax.ShapeDtypeStruct((B, 1, C), jnp.float32)),
            grid=(B, nt),
            in_specs=[pl.BlockSpec((1, tile_n, C), lambda b, i: (b, i, 0))],
            out_specs=(pl.BlockSpec((1, 1, C), lambda b, i: (b, 0, 0)),
                       pl.BlockSpec((1, 1, C), lambda b, i: (b, 0, 0))),
            compiler_params=pltpu.CompilerParams(
                dimension_semantics=("parallel", "arbitrary"),
                vmem_limit_bytes=vmem_limit),
        )(x)

        return pl.pallas_call(
            _in_norm_kernel,
            out_shape=jax.ShapeDtypeStruct((B, N, C), x.dtype),
            grid=(B, nt),
            in_specs=[pl.BlockSpec((1, tile_n, C), lambda b, i: (b, i, 0)),
                      pl.BlockSpec((1, 1, C), lambda b, i: (b, 0, 0)),
                      pl.BlockSpec((1, 1, C), lambda b, i: (b, 0, 0))],
            out_specs=pl.BlockSpec((1, tile_n, C), lambda b, i: (b, i, 0)),
            compiler_params=pltpu.CompilerParams(
                dimension_semantics=("parallel", "parallel"),
                vmem_limit_bytes=vmem_limit),
        )(x, mean, rstd)

    if norm_type == "bn":
        # TODO(synk): training-mode batch stats only; running_mean/var (eval
        # mode) and momentum updates are not modeled, matching the original
        # module's training forward.
        M = B * N
        x2 = x.reshape(M, C)
        tile = _pick_row_tile(M, C, x.dtype, budget)
        n_tiles = pl.cdiv(M, tile)
        n_splits = 2 if n_tiles >= 4 else 1   # both TCs on v7x; neutral on v5e/v6e
        tps = pl.cdiv(n_tiles, n_splits)      # row tiles per split
        needs_mask = n_splits * tps * tile > M

        # Pass 1: per-split per-channel sum / sumsq (tiled reduction over rows).
        psum, psq = pl.pallas_call(
            functools.partial(_bn_stats_kernel, total_rows=M, tile_rows=tile,
                              tiles_per_split=tps, needs_mask=needs_mask),
            out_shape=(jax.ShapeDtypeStruct((n_splits, 1, C), jnp.float32),
                       jax.ShapeDtypeStruct((n_splits, 1, C), jnp.float32)),
            grid=(n_splits, tps),
            in_specs=[pl.BlockSpec(
                (tile, C),
                # Clamp so an uneven split never maps a block past the array;
                # the in-kernel mask zeroes those duplicate tiles' contribution.
                lambda s, i: (jnp.minimum(s * tps + i, n_tiles - 1), 0))],
            out_specs=(pl.BlockSpec((1, 1, C), lambda s, i: (s, 0, 0)),
                       pl.BlockSpec((1, 1, C), lambda s, i: (s, 0, 0))),
            compiler_params=pltpu.CompilerParams(
                dimension_semantics=("parallel", "arbitrary"),
                vmem_limit_bytes=vmem_limit),
        )(x2)

        # Tiny epilogue: combine the per-split partials and fold the affine
        # transform into a single scale/shift pair for pass 2.
        ssum = jnp.sum(psum, axis=0)                  # (1, C)
        ssq = jnp.sum(psq, axis=0)                    # (1, C)
        mean = ssum / M
        var = jnp.maximum(ssq / M - mean * mean, 0.0)
        rstd = lax.rsqrt(var + _EPS_NORM)
        w2 = params["weight"].reshape(1, C).astype(jnp.float32)
        b2 = params["bias"].reshape(1, C).astype(jnp.float32)
        scale = rstd * w2
        shift = b2 - mean * scale

        # Pass 2: tiled elementwise normalize.
        y2 = pl.pallas_call(
            _affine_kernel,
            out_shape=jax.ShapeDtypeStruct((M, C), x.dtype),
            grid=(n_tiles,),
            in_specs=[pl.BlockSpec((tile, C), lambda i: (i, 0)),
                      pl.BlockSpec((1, C), lambda i: (0, 0)),
                      pl.BlockSpec((1, C), lambda i: (0, 0))],
            out_specs=pl.BlockSpec((tile, C), lambda i: (i, 0)),
            compiler_params=pltpu.CompilerParams(
                dimension_semantics=("parallel",),
                vmem_limit_bytes=vmem_limit),
        )(x2, scale, shift)
        return y2.reshape(B, N, C)

    raise ValueError(f"unknown norm_type {norm_type}")


# ---------------- pure-JAX references (sanity check) ----------------

def _ref(x, norm_type, params):
    if norm_type == "none":
        return x
    if norm_type == "ln":
        m = jnp.mean(x, -1, keepdims=True)
        v = jnp.mean((x - m) ** 2, -1, keepdims=True)
        return (x - m) / jnp.sqrt(v + _EPS_NORM) * params["weight"] + params["bias"]
    if norm_type == "pn":
        return x * lax.rsqrt(jnp.mean(x ** 2, -1, keepdims=True) + _EPS_PN)
    if norm_type == "in":
        m = jnp.mean(x, 1, keepdims=True)
        v = jnp.mean((x - m) ** 2, 1, keepdims=True)
        return (x - m) / jnp.sqrt(v + _EPS_NORM)
    if norm_type == "bn":
        m = jnp.mean(x, (0, 1), keepdims=True)
        v = jnp.mean((x - m) ** 2, (0, 1), keepdims=True)
        return (x - m) / jnp.sqrt(v + _EPS_NORM) * params["weight"] + params["bias"]


if __name__ == "__main__":
    key = jax.random.PRNGKey(0)

    # (shape, forced tile budget).  The forced-small-budget runs exercise the
    # multi-tile, masked-boundary, two-TC-split and tiled-InstanceNorm paths at
    # small shapes; budget=None uses the per-chip automatic sizing.
    test_cases = [
        ((2, 8, 32), None),
        ((2, 600, 128), None),
        ((2, 600, 128), 64 * 1024),   # multi-tile + partial boundary tile + split
        ((2, 300, 128), 64 * 1024),   # odd tile count: clamped uneven split
    ]

    for (B, N, C), forced_budget in test_cases:
        key, kx, kw, kb = jax.random.split(key, 4)
        x = jax.random.normal(kx, (B, N, C), dtype=jnp.float32)
        params = {
            "weight": jax.random.normal(kw, (C,), dtype=jnp.float32) * 0.5 + 1.0,
            "bias": jax.random.normal(kb, (C,), dtype=jnp.float32) * 0.1,
        }
        for nt in ("ln", "bn", "in", "pn", "none"):
            out = custom_norm(x, nt, params, tile_budget_bytes=forced_budget)
            out = jax.block_until_ready(out)
            ref = _ref(x, nt, params)
            assert out.shape == (B, N, C)
            assert jnp.allclose(out, ref, atol=1e-4, rtol=1e-4), \
                f"mismatch for {nt} at shape {(B, N, C)} budget={forced_budget}"

    print("KERNEL_OK")
</pallas_src>

<mosaic_0001>
module attributes {stable_mosaic.version = 11 : i64} {
  func.func @_ln_kernel(%arg0: i32, %arg1: memref<16x32xf32, #tpu.memory_space<vmem>>, %arg2: memref<1x32xf32, #tpu.memory_space<vmem>>, %arg3: memref<1x32xf32, #tpu.memory_space<vmem>>, %arg4: memref<16x32xf32, #tpu.memory_space<vmem>>) attributes {dimension_semantics = [#tpu.dimension_semantics<parallel>], iteration_bounds = array<i64: 1>, scalar_prefetch = 0 : i64, scratch_operands = 0 : i64, tpu.core_type = #tpu.core_type<tc>, window_params = [{transform_indices = @transform_0, window_bounds = array<i64: 16, 32>}, {pipeline_mode = #tpu.pipeline_mode<synchronous>, transform_indices = @transform_1, window_bounds = array<i64: 1, 32>}, {pipeline_mode = #tpu.pipeline_mode<synchronous>, transform_indices = @transform_2, window_bounds = array<i64: 1, 32>}, {transform_indices = @transform_3, window_bounds = array<i64: 16, 32>}]} {
    %c0 = arith.constant 0 : index
    %c0_0 = arith.constant 0 : index
    %0 = vector.load %arg1[%c0, %c0_0] : memref<16x32xf32, #tpu.memory_space<vmem>>, vector<16x32xf32>
    %cst = arith.constant dense<0.000000e+00> : vector<16xf32>
    %1 = vector.multi_reduction <add>, %0, %cst [1] : vector<16x32xf32> to vector<16xf32>
    %2 = vector.shape_cast %1 : vector<16xf32> to vector<16x1xf32>
    %3 = arith.mulf %0, %0 : vector<16x32xf32>
    %cst_1 = arith.constant dense<0.000000e+00> : vector<16xf32>
    %4 = vector.multi_reduction <add>, %3, %cst_1 [1] : vector<16x32xf32> to vector<16xf32>
    %5 = vector.shape_cast %4 : vector<16xf32> to vector<16x1xf32>
    %cst_2 = arith.constant 3.125000e-02 : f32
    %6 = vector.broadcast %cst_2 : f32 to vector<16x1xf32>
    %7 = arith.mulf %2, %6 : vector<16x1xf32>
    %cst_3 = arith.constant 3.125000e-02 : f32
    %8 = vector.broadcast %cst_3 : f32 to vector<16x1xf32>
    %9 = arith.mulf %5, %8 : vector<16x1xf32>
    %10 = arith.mulf %7, %7 : vector<16x1xf32>
    %11 = arith.subf %9, %10 : vector<16x1xf32>
    %cst_4 = arith.constant 0.000000e+00 : f32
    %12 = vector.broadcast %cst_4 : f32 to vector<16x1xf32>
    %13 = arith.maximumf %11, %12 : vector<16x1xf32>
    %cst_5 = arith.constant 9.99999974E-6 : f32
    %14 = vector.broadcast %cst_5 : f32 to vector<16x1xf32>
    %15 = arith.addf %13, %14 : vector<16x1xf32>
    %16 = math.rsqrt %15 : vector<16x1xf32>
    %17 = vector.broadcast %7 : vector<16x1xf32> to vector<16x32xf32>
    %18 = arith.subf %0, %17 : vector<16x32xf32>
    %19 = vector.broadcast %16 : vector<16x1xf32> to vector<16x32xf32>
    %20 = arith.mulf %18, %19 : vector<16x32xf32>
    %c0_6 = arith.constant 0 : index
    %c0_7 = arith.constant 0 : index
    %21 = vector.load %arg2[%c0_6, %c0_7] : memref<1x32xf32, #tpu.memory_space<vmem>>, vector<1x32xf32>
    %22 = vector.broadcast %21 : vector<1x32xf32> to vector<16x32xf32>
    %23 = arith.mulf %20, %22 : vector<16x32xf32>
    %c0_8 = arith.constant 0 : index
    %c0_9 = arith.constant 0 : index
    %24 = vector.load %arg3[%c0_8, %c0_9] : memref<1x32xf32, #tpu.memory_space<vmem>>, vector<1x32xf32>
    %25 = vector.broadcast %24 : vector<1x32xf32> to vector<16x32xf32>
    %26 = arith.addf %23, %25 : vector<16x32xf32>
    %c0_10 = arith.constant 0 : index
    %c0_11 = arith.constant 0 : index
    %27 = vector.load %arg4[%c0_10, %c0_11] : memref<16x32xf32, #tpu.memory_space<vmem>>, vector<16x32xf32>
    tpu.vector_store %arg4[%c0_10, %c0_11], %26 {strides = array<i32>} : memref<16x32xf32, #tpu.memory_space<vmem>>, vector<16x32xf32>,
    return
  }
  func.func @transform_0(%arg0: i32) -> (i32, i32) {
    %c0_i32 = arith.constant 0 : i32
    %c0_i32_0 = arith.constant 0 : i32
    return %arg0, %c0_i32 : i32, i32
  }
  func.func @transform_1(%arg0: i32) -> (i32, i32) {
    %c0_i32 = arith.constant 0 : i32
    %c0_i32_0 = arith.constant 0 : i32
    %c0_i32_1 = arith.constant 0 : i32
    return %c0_i32, %c0_i32_0 : i32, i32
  }
  func.func @transform_2(%arg0: i32) -> (i32, i32) {
    %c0_i32 = arith.constant 0 : i32
    %c0_i32_0 = arith.constant 0 : i32
    %c0_i32_1 = arith.constant 0 : i32
    return %c0_i32, %c0_i32_0 : i32, i32
  }
  func.func @transform_3(%arg0: i32) -> (i32, i32) {
    %c0_i32 = arith.constant 0 : i32
    %c0_i32_0 = arith.constant 0 : i32
    return %arg0, %c0_i32 : i32, i32
  }
}

</mosaic_0001>

<bundles_post_ra>
// kernel: tpu_custom_call.1
= control target key start
LH: loop header
LB: loop body
LE: loop exit
PB: predicated region body
PF: predicated region fallthrough
CT: control target
= control target key end

     0   :  { %8 = vsyncpa [#allocation3], 0  ;;  %s225_s0 = inlined_call_operand.hbm [shape: f32[16,32], index: 0, kind: input, shape index: {}]   ;;  %s226_s1 = inlined_call_operand.vmem [shape: f32[1,32], index: 1, kind: input, shape index: {}]   ;;  %s227_s2 = inlined_call_operand.vmem [shape: f32[1,32], index: 2, kind: input, shape index: {}]   ;;  %s228_s3 = inlined_call_operand.hbm [shape: f32[16,32], index: 3, kind: output, shape index: {}]  }
   0x1   :  { %9 = vsyncpa [#allocation4], 0  ;;  %s159_s12 = smov [#allocation2]   ;;  %s111_s16 = scalar_lea.hbm %s225_s0, 256 }
   0x2   :  { %s15_s13 = sshll.u32 %s159_s12, 4  ;;  %p112_p0 = scmp.ne.s32.totalorder %s225_s0, %s111_s16  ;;  %s16_s13 = int_to_ptr.vmem [resolvable:$true] %s15_s13 }
   0x3   :  { %p115_p1 = scmp.lt.u32.totalorder %s111_s16, %s225_s0 }
   0x5   :  { %p117_p2 = pnand %p115_p1, %p112_p0 }
   0x7   :  { %120 = shalt.err (!%p117_p2)
}
   0x8   :  { %s121_s21 = scalar_lea.vmem %s16_s13, 256  ;;  %p126_p4 = scmp.lt.s32.totalorder %s16_s13, %s16_s13 }
   0x9   :  { %p122_p3 = scmp.ne.s32.totalorder %s16_s13, %s121_s21  ;;  %p127_p5 = scmp.lt.s32.totalorder %s121_s21, %s121_s21 }
   0xb   :  { %p128_p6 = por %p127_p5, %p126_p4 }
   0xd   :  { %p129_p7 = pnand %p128_p6, %p122_p3 }
   0xf   :  { %132 = shalt.err (!%p129_p7)
}
  0x10   :  { %s160_s22 = smov 128   ;;  %s161_s23 = smov 8  }
  0x11   :  { %21 = dma.hbm_to_vmem [thread:$0]  %s225_s0, 256, %s16_s13, [#allocation3], %s160_s22, %s160_s22, %s161_s23  }
  0x12   :  { %155 = dma.done.wait [#allocation3], 256  }
  0x13   :  { %156 = vsyncadd [#allocation3], 4294967040  ;;  %vm31_vm0 = vcmask 261120   ;;  %v29_v0 = vld [vmem:[#allocation2] sm:$0xff]  ;;  %v30_v1 = vld [vmem:[#allocation2 + $0x8] sm:$0xff]  ;;  %s162_s29 = smov [#allocation5]  }
  0x14   :  { %v32_v2 = vsel %vm31_vm0, %v29_v0, 0.0  ;;  %v38_v3 = vmul.f32 %v29_v0, %v29_v0  ;;  %v39_v4 = vmul.f32 %v30_v1, %v30_v1  ;;  %v35_v6 = vsel %vm31_vm0, %v30_v1, 0.0  ;;  %v101_v26 = vld [vmem:[%s226_s1] ss:$0 sm:$0xff]  ;;  %s89_s30 = sshll.u32 %s162_s29, 4  ;;  %s90_s30 = int_to_ptr.vmem [resolvable:$true] %s89_s30 }
  0x15   :  { %33 = vadd.xlane.f32.xlu0 %v32_v2  ;;  %v102_v28 = vld [vmem:[%s227_s2] ss:$0 sm:$0xff]  ;;  %s133_s1 = scalar_lea.vmem %s90_s30, 256  ;;  %p138_p9 = scmp.lt.s32.totalorder %s90_s30, %s90_s30 }
  0x16   :  { %v40_v5 = vsel %vm31_vm0, %v38_v3, 0.0  ;;  %v43_v7 = vsel %vm31_vm0, %v39_v4, 0.0  ;;  %p134_p8 = scmp.ne.s32.totalorder %s90_s30, %s133_s1  ;;  %p139_p10 = scmp.lt.s32.totalorder %s133_s1, %s133_s1 }
  0x17   :  { %41 = vadd.xlane.f32.xlu1 %v40_v5 }
  0x18   :  { %p140_p11 = por %p139_p10, %p138_p9 }
  0x19   :  { %36 = vadd.xlane.f32.xlu0 %v35_v6 }
  0x1a   :  { %p141_p12 = pnand %p140_p11, %p134_p8 }
  0x1b   :  { %44 = vadd.xlane.f32.xlu1 %v43_v7 }
  0xa2   :  { %v34_v8 = vpop.xlane.xlu0 %33 }
  0xa3   :  { %v46_v9 = vmul.f32 0.03125, %v34_v8 }
  0xa4   :  { %v42_v10 = vpop.xlane.xlu1 %41 }
  0xa5   :  { %v50_v11 = vmul.f32 %v46_v9, %v46_v9  ;;  %v48_v12 = vmul.f32 0.03125, %v42_v10  ;;  %v60_v24 = vsub.f32 %v29_v0, %v46_v9 }
  0xa6   :  { %v37_v13 = vpop.xlane.xlu0 %36 }
  0xa7   :  { %v52_v14 = vsub.f32 %v48_v12, %v50_v11  ;;  %v47_v15 = vmul.f32 0.03125, %v37_v13 }
  0xa8   :  { %v45_v16 = vpop.xlane.xlu1 %44 }
  0xa9   :  { %v54_v17 = vmax.f32 %v52_v14, 0.0  ;;  %v51_v18 = vmul.f32 %v47_v15, %v47_v15  ;;  %v49_v19 = vmul.f32 0.03125, %v45_v16  ;;  %v61_v29 = vsub.f32 %v30_v1, %v47_v15 }
  0xab   :  { %v56_v20 = vadd.f32 1e-05, %v54_v17  ;;  %v53_v21 = vsub.f32 %v49_v19, %v51_v18 }
  0xad   :  { %107 = vrsqrt.f32 %v56_v20  ;;  %v55_v22 = vmax.f32 %v53_v21, 0.0 }
  0xaf   :  { %v57_v23 = vadd.f32 1e-05, %v55_v22 }
  0xb1   :  { %109 = vrsqrt.f32 %v57_v23 }
  0xb7   :  { %v108_v25 = vpop.eup %107 }
  0xb8   :  { %v62_v27 = vmul.f32 %v108_v25, %v60_v24 }
  0xba   :  { %v71_v30 = vmul.f32 %v101_v26, %v62_v27 }
  0xbb   :  { %v110_v31 = vpop.eup %109 }
  0xbc   :  { %v63_v32 = vmul.f32 %v110_v31, %v61_v29  ;;  %v80_v33 = vadd.f32 %v102_v28, %v71_v30 }
  0xbe   :  { %v72_v34 = vmul.f32 %v101_v26, %v63_v32  ;;  %82 = vst.msk [vmem:[#allocation5] sm:$0xff] %vm31_vm0, %v80_v33 }
  0xc0   :  { %v81_v35 = vadd.f32 %v102_v28, %v72_v34 }
  0xc2   :  { %83 = vst.msk [vmem:[#allocation5 + $0x8] sm:$0xff] %vm31_vm0, %v81_v35 }
  0xc3   :  { %144 = shalt.err (!%p141_p12)
}
  0xc4   :  { %s145_s5 = scalar_lea.hbm %s228_s3, 256 }
  0xc5   :  { %p146_p13 = scmp.ne.s32.totalorder %s228_s3, %s145_s5  ;;  %p149_p0 = scmp.lt.u32.totalorder %s145_s5, %s228_s3 }
  0xc7   :  { %p151_p1 = pnand %p149_p0, %p146_p13 }
  0xc9   :  { %154 = shalt.err (!%p151_p1)
}
  0xca   :  { %95 = dma.vmem_to_hbm [thread:$0]  %s90_s30, 256, %s228_s3, [#allocation4], %s160_s22, %s160_s22, %s161_s23  }
  0xcb   :  { %157 = dma.done.wait [#allocation4], 256  }
  0xcc   :  { %158 = vsyncadd [#allocation4], 4294967040 }
  0xcd   :  { %99 = vsyncpa [#allocation3], 1 }
  0xce   :  { %100 = vsyncpa [#allocation4], 1 }

</bundles_post_ra>
